<compile_context>
chip_gen: v6e
topology: v6e:2x2x1
jax: 0.10.0
libtpu: 0.0.40
codegen_flags: <defaults>
</compile_context>

<pallas_src>
import math

import jax
import jax.numpy as jnp
from jax.experimental import pallas as pl
from jax.experimental.pallas import tpu as pltpu

IMAGENET_DEFAULT_STD = (0.229, 0.224, 0.225)

_LANE = 128
_SUBLANE = 8
_MAX_BLOCK_BATCH = 8
# Target for the double-buffered input working set (2 tensors x 2 buffers),
# sized for v7x's 64 MiB/TC VMEM; also leaves headroom on v5e/v6e (128 MiB).
_INPUT_WORKING_SET_BYTES = 24 * 1024 * 1024


def _largest_divisor_leq(n: int, cap: int) -> int:
    for d in range(min(n, cap), 0, -1):
        if n % d == 0:
            return d
    return 1


def _plan_blocks(batch, hw, itemsize, block_batch=None, rows_per_chunk=None):
    """Pick (BB, TM, n_chunks, hw_padded); image blocks are (BB, 3, TM, 128)."""
    if block_batch is None:
        bb = _largest_divisor_leq(batch, _MAX_BLOCK_BATCH)
    else:
        bb = block_batch
        assert batch % bb == 0, "block_batch must divide the batch size"

    rows = -(-hw // _LANE)                      # lane rows (hw padded up to x128)
    per_row_bytes = bb * 3 * _LANE * itemsize   # one lane-row of one tensor in one block
    max_rows = max(_SUBLANE, _INPUT_WORKING_SET_BYTES // (4 * per_row_bytes))

    if rows_per_chunk is not None:
        if rows_per_chunk >= rows:
            tm = rows
        else:
            tm = rows_per_chunk
            assert tm % _SUBLANE == 0, "rows_per_chunk must be a multiple of 8 when chunking"
            rows = -(-rows // tm) * tm
    elif rows <= max_rows:
        tm = rows                               # single chunk: full-extent block is always legal
    else:
        rows = -(-rows // _SUBLANE) * _SUBLANE  # pad so a multiple-of-8 TM exists
        tm = _SUBLANE
        for cand in range(_SUBLANE, int(max_rows) + 1, _SUBLANE):
            if rows % cand == 0:
                tm = cand

    return bb, tm, rows // tm, rows * _LANE


def _sq_diff_partial_kernel(x_ref, rec_ref, out_ref):
    """Streamed sum of squared differences, reduced per channel / per lane.

    Blocks are lane-dense (BB, 3, TM, 128); each step reduces its tile to a
    (3, 128) partial (VALU tree over batch + one sublane reduce), so the hot
    loop is 2 vld + ~3 VALU per vreg with no full-tile accumulator traffic.
    Each batch-block owns its own (1, 3, 128) output slice, so the batch grid
    axis can be 'parallel' (v7x megacore) without a shared accumulator.
    """
    @pl.when(pl.program_id(1) == 0)
    def _():
        out_ref[...] = jnp.zeros_like(out_ref)

    d = rec_ref[...].astype(jnp.float32) - x_ref[...].astype(jnp.float32)  # (BB,3,TM,128)
    sq = d * d
    part = jnp.sum(jnp.sum(sq, axis=0), axis=1)   # (3, TM, 128) -> (3, 128)
    out_ref[...] += part[None]


def joint_loss(inputs, outputs, labels, *, alpha, beta,
               block_batch=None, rows_per_chunk=None):
    """alpha * CE(outputs_cls, labels) + beta * denorm-MSE(rec, inputs) + bpp."""
    outputs_cls, outputs_rec, y_lik, z_lik = outputs
    B, C, H, W = inputs.shape
    assert C == 3, "DenormalizedMSELoss assumes 3 channels"
    hw = H * W
    num_pixels = B * hw

    itemsize = max(jnp.dtype(inputs.dtype).itemsize,
                   jnp.dtype(outputs_rec.dtype).itemsize)
    bb, tm, n_chunks, hw_padded = _plan_blocks(B, hw, itemsize,
                                               block_batch, rows_per_chunk)
    rows = hw_padded // _LANE
    n_bblocks = B // bb

    def to_lane_tiles(x):
        x = x.reshape(B, 3, hw)
        if hw_padded != hw:
            # zero-pad both tensors identically: diff == 0 there, exact result
            x = jnp.pad(x, ((0, 0), (0, 0), (0, hw_padded - hw)))
        return x.reshape(B, 3, rows, _LANE)

    x4 = to_lane_tiles(inputs)
    r4 = to_lane_tiles(outputs_rec)

    img_spec = pl.BlockSpec((bb, 3, tm, _LANE), lambda i, j: (i, 0, j, 0))
    out_spec = pl.BlockSpec((1, 3, _LANE), lambda i, j: (i, 0, 0))

    in_bytes = (x4.size * jnp.dtype(x4.dtype).itemsize
                + r4.size * jnp.dtype(r4.dtype).itemsize)
    cost = pl.CostEstimate(
        flops=3 * x4.size,
        transcendentals=0,
        bytes_accessed=in_bytes + n_bblocks * 3 * _LANE * 4,
    )

    block_bytes = bb * 3 * tm * _LANE * itemsize
    vmem_limit = min(100 * 1024 * 1024, max(32 * 1024 * 1024, 6 * block_bytes))

    partials = pl.pallas_call(
        _sq_diff_partial_kernel,
        out_shape=jax.ShapeDtypeStruct((n_bblocks, 3, _LANE), jnp.float32),
        grid_spec=pltpu.PrefetchScalarGridSpec(
            num_scalar_prefetch=0,
            grid=(n_bblocks, n_chunks),
            in_specs=[img_spec, img_spec],
            out_specs=out_spec,
        ),
        compiler_params=pltpu.CompilerParams(
            dimension_semantics=("parallel", "arbitrary"),
            vmem_limit_bytes=vmem_limit,
        ),
        cost_estimate=cost,
    )(x4, r4)

    # ---- tiny one-time tail in plain XLA (per perf review: negligible cost) ----
    # denormalized MSE: per-channel (std_c * 255)^2 applied once to the partials
    channel_sq = jnp.sum(partials, axis=(0, 2))                          # (3,)
    std_sq = jnp.asarray([(s * 255.0) ** 2 for s in IMAGENET_DEFAULT_STD],
                         jnp.float32)
    mse_loss = jnp.dot(channel_sq, std_sq) / jnp.float32(B * 3 * hw)

    # cross-entropy (mean) == nn.CrossEntropyLoss() default
    logp = jax.nn.log_softmax(outputs_cls.astype(jnp.float32), axis=-1)
    lbl = labels.astype(jnp.int32)[:, None]
    cls_loss = -jnp.mean(jnp.take_along_axis(logp, lbl, axis=-1))

    bpp_loss = (jnp.sum(jnp.log(y_lik.astype(jnp.float32)))
                + jnp.sum(jnp.log(z_lik.astype(jnp.float32)))) / (
                    -math.log(2.0) * num_pixels)

    return alpha * cls_loss + beta * mse_loss + bpp_loss


def _reference(inputs, outputs, labels, *, alpha, beta):
    """Pure-JAX reference mirroring the PyTorch JointLoss."""
    outputs_cls, outputs_rec, y_lik, z_lik = outputs
    B, _, H, W = inputs.shape
    num_pixels = B * H * W
    logp = jax.nn.log_softmax(outputs_cls.astype(jnp.float32), axis=-1)
    cls_loss = -jnp.mean(jnp.take_along_axis(
        logp, labels.astype(jnp.int32)[:, None], axis=-1))
    std = jnp.asarray(IMAGENET_DEFAULT_STD, jnp.float32).reshape(1, 3, 1, 1)
    diff = (outputs_rec.astype(jnp.float32) - inputs.astype(jnp.float32)) * std * 255.0
    mse_loss = jnp.mean(diff ** 2)
    bpp_loss = (jnp.sum(jnp.log(y_lik)) + jnp.sum(jnp.log(z_lik))) / (
        -math.log(2.0) * num_pixels)
    return alpha * cls_loss + beta * mse_loss + bpp_loss


if __name__ == "__main__":
    key = jax.random.PRNGKey(0)
    ks = jax.random.split(key, 4)

    alpha, beta = 1.0, 0.01
    NUM_CLASSES = 10

    def make_case(k, B, H, W, dtype=jnp.float32):
        k1, k2, k3, k4, k5, k6 = jax.random.split(k, 6)
        inputs = jax.random.normal(k1, (B, 3, H, W), jnp.float32)
        rec = inputs + 0.05 * jax.random.normal(k2, (B, 3, H, W), jnp.float32)
        inputs = inputs.astype(dtype)
        rec = rec.astype(dtype)
        cls = jax.random.normal(k3, (B, NUM_CLASSES), jnp.float32)
        labels = jax.random.randint(k4, (B,), 0, NUM_CLASSES, jnp.int32)
        # likelihoods are probabilities in (0, 1]
        y_lik = jax.random.uniform(k5, (B, 8, 4, 4), jnp.float32, 1e-3, 1.0)
        z_lik = jax.random.uniform(k6, (B, 4, 2, 2), jnp.float32, 1e-3, 1.0)
        return inputs, (cls, rec, y_lik, z_lik), labels

    def check(name, inputs, outputs, labels, rtol=1e-5, atol=1e-5, **kw):
        # reference computed in f32 from the same (possibly bf16-rounded) values
        cls, rec, yl, zl = outputs
        ref = _reference(inputs.astype(jnp.float32),
                         (cls, rec.astype(jnp.float32), yl, zl),
                         labels, alpha=alpha, beta=beta)
        got = joint_loss(inputs, outputs, labels, alpha=alpha, beta=beta, **kw)
        jax.block_until_ready(got)
        assert jnp.allclose(got, ref, rtol=rtol, atol=atol), (name, got, ref)

    # 1) basic f32 path (single chunk per batch-block)
    check("f32_basic", *make_case(ks[0], B=2, H=16, W=16))

    # 2) multiple batch-blocks + multiple lane chunks (exercises j-axis accumulation)
    check("f32_chunked", *make_case(ks[1], B=4, H=64, W=32),
          block_batch=2, rows_per_chunk=8)

    # 3) spatial size not divisible by 128 lanes (zero-pad path)
    check("f32_padded", *make_case(ks[2], B=2, H=10, W=10))

    # 4) bf16 image streams (half the HBM bytes); kernel upcasts to f32
    check("bf16_stream", *make_case(ks[3], B=2, H=16, W=16, dtype=jnp.bfloat16),
          rtol=1e-4, atol=1e-4)

    print("KERNEL_OK")
</pallas_src>

<mosaic_0001>
module attributes {stable_mosaic.version = 11 : i64} {
  func.func @_sq_diff_partial_kernel(%arg0: i32, %arg1: i32, %arg2: memref<2x3x2x128xf32, #tpu.memory_space<vmem>>, %arg3: memref<2x3x2x128xf32, #tpu.memory_space<vmem>>, %arg4: memref<1x3x128xf32, #tpu.memory_space<vmem>>) attributes {dimension_semantics = [#tpu.dimension_semantics<parallel>, #tpu.dimension_semantics<arbitrary>], iteration_bounds = array<i64: 1, 1>, scalar_prefetch = 0 : i64, scratch_operands = 0 : i64, tpu.core_type = #tpu.core_type<tc>, window_params = [{transform_indices = @transform_0, window_bounds = array<i64: 2, 3, 2, 128>}, {transform_indices = @transform_1, window_bounds = array<i64: 2, 3, 2, 128>}, {transform_indices = @transform_2, window_bounds = array<i64: 1, 3, 128>}]} {
    %c0_i32 = arith.constant 0 : i32
    %0 = arith.cmpi eq, %arg1, %c0_i32 : i32
    %1 = arith.extui %0 : i1 to i32
    %c0_i32_0 = arith.constant 0 : i32
    %2 = arith.cmpi ne, %1, %c0_i32_0 : i32
    scf.if %2 {
      %cst_15 = arith.constant 0.000000e+00 : f32
      %13 = vector.broadcast %cst_15 : f32 to vector<1x3x128xf32>
      %c0_16 = arith.constant 0 : index
      %c0_17 = arith.constant 0 : index
      %c0_18 = arith.constant 0 : index
      %14 = vector.load %arg4[%c0_16, %c0_17, %c0_18] : memref<1x3x128xf32, #tpu.memory_space<vmem>>, vector<1x3x128xf32>
      tpu.vector_store %arg4[%c0_16, %c0_17, %c0_18], %13 {strides = array<i32>} : memref<1x3x128xf32, #tpu.memory_space<vmem>>, vector<1x3x128xf32>,
    } else {
    }
    %c0 = arith.constant 0 : index
    %c0_1 = arith.constant 0 : index
    %c0_2 = arith.constant 0 : index
    %c0_3 = arith.constant 0 : index
    %3 = vector.load %arg3[%c0, %c0_1, %c0_2, %c0_3] : memref<2x3x2x128xf32, #tpu.memory_space<vmem>>, vector<2x3x2x128xf32>
    %c0_4 = arith.constant 0 : index
    %c0_5 = arith.constant 0 : index
    %c0_6 = arith.constant 0 : index
    %c0_7 = arith.constant 0 : index
    %4 = vector.load %arg2[%c0_4, %c0_5, %c0_6, %c0_7] : memref<2x3x2x128xf32, #tpu.memory_space<vmem>>, vector<2x3x2x128xf32>
    %5 = arith.subf %3, %4 : vector<2x3x2x128xf32>
    %6 = arith.mulf %5, %5 : vector<2x3x2x128xf32>
    %cst = arith.constant dense<0.000000e+00> : vector<3x2x128xf32>
    %7 = vector.multi_reduction <add>, %6, %cst [0] : vector<2x3x2x128xf32> to vector<3x2x128xf32>
    %cst_8 = arith.constant dense<0.000000e+00> : vector<3x128xf32>
    %8 = vector.multi_reduction <add>, %7, %cst_8 [1] : vector<3x2x128xf32> to vector<3x128xf32>
    %c0_9 = arith.constant 0 : index
    %c0_10 = arith.constant 0 : index
    %c0_11 = arith.constant 0 : index
    %9 = vector.load %arg4[%c0_9, %c0_10, %c0_11] : memref<1x3x128xf32, #tpu.memory_space<vmem>>, vector<1x3x128xf32>
    %10 = vector.shape_cast %8 : vector<3x128xf32> to vector<1x3x128xf32>
    %11 = arith.addf %9, %10 : vector<1x3x128xf32>
    %c0_12 = arith.constant 0 : index
    %c0_13 = arith.constant 0 : index
    %c0_14 = arith.constant 0 : index
    %12 = vector.load %arg4[%c0_12, %c0_13, %c0_14] : memref<1x3x128xf32, #tpu.memory_space<vmem>>, vector<1x3x128xf32>
    tpu.vector_store %arg4[%c0_12, %c0_13, %c0_14], %11 {strides = array<i32>} : memref<1x3x128xf32, #tpu.memory_space<vmem>>, vector<1x3x128xf32>,
    return
  }
  func.func @transform_0(%arg0: i32, %arg1: i32) -> (i32, i32, i32, i32) {
    %c0_i32 = arith.constant 0 : i32
    %c0_i32_0 = arith.constant 0 : i32
    %c0_i32_1 = arith.constant 0 : i32
    return %arg0, %c0_i32, %arg1, %c0_i32_0 : i32, i32, i32, i32
  }
  func.func @transform_1(%arg0: i32, %arg1: i32) -> (i32, i32, i32, i32) {
    %c0_i32 = arith.constant 0 : i32
    %c0_i32_0 = arith.constant 0 : i32
    %c0_i32_1 = arith.constant 0 : i32
    return %arg0, %c0_i32, %arg1, %c0_i32_0 : i32, i32, i32, i32
  }
  func.func @transform_2(%arg0: i32, %arg1: i32) -> (i32, i32, i32) {
    %c0_i32 = arith.constant 0 : i32
    %c0_i32_0 = arith.constant 0 : i32
    %c0_i32_1 = arith.constant 0 : i32
    return %arg0, %c0_i32, %c0_i32_0 : i32, i32, i32
  }
}

</mosaic_0001>

<bundles_post_ra>
// kernel: tpu_custom_call.1
= control target key start
LH: loop header
LB: loop body
LE: loop exit
PB: predicated region body
PF: predicated region fallthrough
CT: control target
= control target key end

     0   :  { %7 = vsyncpa [#allocation3], 0  ;;  %s209_s0 = inlined_call_operand.hbm [shape: f32[2,3,2,128], index: 0, kind: input, shape index: {}]   ;;  %s210_s1 = inlined_call_operand.hbm [shape: f32[2,3,2,128], index: 1, kind: input, shape index: {}]   ;;  %s211_s2 = inlined_call_operand.vmem [shape: f32[1,3,128], index: 2, kind: output, shape index: {}]  }
   0x1   :  { %8 = vsyncpa [#allocation5], 0  ;;  %s165_s9 = smov [#allocation2]  }
   0x2   :  { %s14_s10 = sshll.u32 %s165_s9, 4  ;;  %s15_s10 = int_to_ptr.vmem [resolvable:$true] %s14_s10 }
   0x3   :  { %s129_s11 = scalar_lea.vmem %s15_s10, 192  ;;  %p134_p1 = scmp.lt.s32.totalorder %s15_s10, %s15_s10 }
   0x4   :  { %p130_p0 = scmp.ne.s32.totalorder %s15_s10, %s129_s11  ;;  %p135_p2 = scmp.lt.s32.totalorder %s129_s11, %s129_s11 }
   0x6   :  { %p136_p3 = por %p135_p2, %p134_p1 }
   0x8   :  { %p137_p4 = pnand %p136_p3, %p130_p0 }
   0xa   :  { %140 = shalt.err (!%p137_p4)
}
   0xb   :  { %s166_s12 = smov 32   ;;  %s167_s13 = smov 2  }
   0xc   :  { %20 = dma.hbm_to_vmem [thread:$0]  %s209_s0, 192, %s15_s10, [#allocation3], %s166_s12, %s166_s12, %s167_s13  }
   0xd   :  { %s168_s16 = smov [#allocation4]  }
   0xe   :  { %s26_s17 = sshll.u32 %s168_s16, 4  ;;  %s27_s17 = int_to_ptr.vmem [resolvable:$true] %s26_s17 }
   0xf   :  { %s149_s18 = scalar_lea.vmem %s27_s17, 192  ;;  %p154_p6 = scmp.lt.s32.totalorder %s27_s17, %s27_s17 }
  0x10   :  { %p150_p5 = scmp.ne.s32.totalorder %s27_s17, %s149_s18  ;;  %p155_p7 = scmp.lt.s32.totalorder %s149_s18, %s149_s18 }
  0x12   :  { %p156_p8 = por %p155_p7, %p154_p6 }
  0x14   :  { %p157_p9 = pnand %p156_p8, %p150_p5 }
  0x16   :  { %160 = shalt.err (!%p157_p9)
}
  0x17   :  { %32 = dma.hbm_to_vmem [thread:$0]  %s210_s1, 192, %s27_s17, [#allocation5], %s166_s12, %s166_s12, %s167_s13  }
  0x18   :  { %161 = dma.done.wait [#allocation3], 192  }
  0x19   :  { %162 = vsyncadd [#allocation3], 4294967104 }
  0x1a   :  { %163 = dma.done.wait [#allocation5], 192  }
  0x1b   :  { %164 = vsyncadd [#allocation5], 4294967104  ;;  %v169_v0 = vmov 0.0   ;;  %v44_v1 = vld [vmem:[#allocation4] sm:$0x3]  ;;  %vm68_vm0 = vcmask 1041408  }
  0x1c   :  { %43 = vst [vmem:[%s211_s2] sm:$0x7] %v169_v0  ;;  %v45_v2 = vld [vmem:[#allocation4 + $0x2] sm:$0x3]  ;;  %v46_v3 = vld [vmem:[#allocation4 + $0x4] sm:$0x3]  ;;  %vm103_vm1 = vcmask 1041409  }
  0x1d   :  { %v47_v4 = vld [vmem:[#allocation4 + $0x6] sm:$0x3]  ;;  %v48_v5 = vld [vmem:[#allocation4 + $0x8] sm:$0x3]  ;;  %v49_v6 = vld [vmem:[#allocation4 + $0xa] sm:$0x3] }
  0x1e   :  { %v50_v7 = vld [vmem:[#allocation2] sm:$0x3]  ;;  %v51_v8 = vld [vmem:[#allocation2 + $0x2] sm:$0x3]  ;;  %v52_v9 = vld [vmem:[#allocation2 + $0x4] sm:$0x3] }
  0x1f   :  { %v53_v10 = vld [vmem:[#allocation2 + $0x6] sm:$0x3]  ;;  %v54_v11 = vld [vmem:[#allocation2 + $0x8] sm:$0x3]  ;;  %v55_v12 = vld [vmem:[#allocation2 + $0xa] sm:$0x3]  ;;  %v56_v13 = vsub.f32 %v44_v1, %v50_v7  ;;  %v57_v14 = vsub.f32 %v45_v2, %v51_v8  ;;  %v58_v15 = vsub.f32 %v46_v3, %v52_v9 }
  0x20   :  { %v59_v16 = vsub.f32 %v47_v4, %v53_v10  ;;  %v60_v17 = vsub.f32 %v48_v5, %v54_v11  ;;  %v61_v18 = vsub.f32 %v49_v6, %v55_v12  ;;  %vm105_vm2 = vcmask 1042434  }
  0x21   :  { %v62_v19 = vmul.f32 %v56_v13, %v56_v13  ;;  %v63_v20 = vmul.f32 %v57_v14, %v57_v14  ;;  %v64_v21 = vmul.f32 %v58_v15, %v58_v15 }
  0x22   :  { %v65_v22 = vmul.f32 %v59_v16, %v59_v16  ;;  %v66_v23 = vmul.f32 %v60_v17, %v60_v17  ;;  %v67_v24 = vmul.f32 %v61_v18, %v61_v18 }
  0x23   :  { %v69_v25 = vsel %vm68_vm0, %v62_v19, 0.0  ;;  %v72_v26 = vsel %vm68_vm0, %v63_v20, 0.0  ;;  %v75_v27 = vsel %vm68_vm0, %v64_v21, 0.0  ;;  %v99_v55 = vld [vmem:[%s211_s2] sm:$0x7] }
  0x24   :  { %v70_v28 = vsel %vm68_vm0, %v65_v22, 0.0  ;;  %v73_v29 = vsel %vm68_vm0, %v66_v23, 0.0  ;;  %v76_v30 = vsel %vm68_vm0, %v67_v24, 0.0 }
  0x25   :  { %v71_v31 = vadd.f32 %v70_v28, %v69_v25  ;;  %v74_v32 = vadd.f32 %v73_v29, %v72_v26  ;;  %v77_v33 = vadd.f32 %v76_v30, %v75_v27 }
  0x27   :  { %v78_v34 = vsel %vm68_vm0, %v71_v31, 0.0  ;;  %v85_v35 = vsel %vm68_vm0, %v74_v32, 0.0  ;;  %v92_v36 = vsel %vm68_vm0, %v77_v33, 0.0 }
  0x28   :  { %v79_v37 = vrot.slane %v78_v34, 4  ;;  %v86_v38 = vrot.slane %v85_v35, 4  ;;  %v93_v39 = vrot.slane %v92_v36, 4 }
  0x2a   :  { %v80_v40 = vadd.f32 %v79_v37, %v78_v34  ;;  %v87_v41 = vadd.f32 %v86_v38, %v85_v35  ;;  %v94_v42 = vadd.f32 %v93_v39, %v92_v36 }
  0x2c   :  { %v81_v43 = vrot.slane %v80_v40, 2  ;;  %v88_v44 = vrot.slane %v87_v41, 2  ;;  %v95_v45 = vrot.slane %v94_v42, 2 }
  0x2e   :  { %v82_v46 = vadd.f32 %v81_v43, %v80_v40  ;;  %v89_v47 = vadd.f32 %v88_v44, %v87_v41  ;;  %v96_v48 = vadd.f32 %v95_v45, %v94_v42 }
  0x30   :  { %v83_v49 = vrot.slane %v82_v46, 1  ;;  %v90_v50 = vrot.slane %v89_v47, 1  ;;  %v97_v51 = vrot.slane %v96_v48, 1 }
  0x32   :  { %v84_v52 = vadd.f32 %v83_v49, %v82_v46  ;;  %v91_v53 = vadd.f32 %v90_v50, %v89_v47  ;;  %v98_v54 = vadd.f32 %v97_v51, %v96_v48 }
  0x34   :  { %v104_v56 = vsel %vm103_vm1, %v91_v53, %v84_v52 }
  0x35   :  { %v106_v57 = vsel %vm105_vm2, %v98_v54, %v104_v56 }
  0x36   :  { %v108_v58 = vadd.f32 %v106_v57, %v99_v55 }
  0x38   :  { %109 = vst [vmem:[%s211_s2] sm:$0x7] %v108_v58 }
  0x39   :  { %114 = vsyncpa [#allocation3], 1 }
  0x3a   :  { %115 = vsyncpa [#allocation5], 1 }

</bundles_post_ra>
